<compile_context>
chip_gen: v7x
topology: tpu7x:2x2x1
jax: 0.10.0
libtpu: 0.0.40
codegen_flags: <defaults>
</compile_context>

<pallas_src>
import jax
import jax.numpy as jnp
from jax.experimental import pallas as pl
from jax.experimental.pallas import tpu as pltpu


def _downsample_conv_kernel(rph_ref, wA_ref, wB_ref, b_ref, o_ref):
    # rph_ref: (1, 3, 2, C, th, Wo+1) row-duplicated phase tile:
    #          rph[0, dy, pc, c, r, b] = x_pad[c, 2*(r0+r)+dy, 2*b+pc]
    # wA_ref : (3, C, 2C)  wA[dy][o, pc*C + i] = W[o, i, dy, pc]   (dx = 0, 1)
    # wB_ref : (3, C, C)   wB[dy][o, i]        = W[o, i, dy, 2]    (dx = 2)
    # b_ref  : (C, 1) bias
    # o_ref  : (1, C, th*Wo) NCHW output tile with flattened (lane-dense) spatial
    C = o_ref.shape[1]
    th = rph_ref.shape[4]
    Wo = rph_ref.shape[5] - 1
    S = th * Wo

    blk = rph_ref[0]                                   # (3, 2, C, th, Wo+1)

    # Tap-group accumulation (all taps live in this single grid step, so a plain
    # f32 value accumulator is equivalent to a VMEM scratch accumulator).
    acc = jnp.zeros((C, S), jnp.float32)
    for dy in range(3):                                # statically unrolled
        # dx = 0 and dx = 1 taps fused into one K = 2C contraction.
        pair = blk[dy, :, :, :, :Wo].reshape(2 * C, S)
        acc = acc + jnp.dot(wA_ref[dy], pair, preferred_element_type=jnp.float32)
        # dx = 2 tap: pc = 0 phase shifted one column right, K = C contraction.
        right = blk[dy, 0, :, :, 1:].reshape(C, S)
        acc = acc + jnp.dot(wB_ref[dy], right, preferred_element_type=jnp.float32)

    o_ref[0] = (acc + b_ref[...].astype(jnp.float32)).astype(o_ref.dtype)


def _pick_tile_h(Ho, Wo, C, itemsize, budget_bytes=8 * 2**20):
    """Largest output-row tile height `th` such that either th == Ho, or
    th % 8 == 0, th | Ho and (th * Wo) % 128 == 0 (aligned, lane-dense blocks),
    with the phase input block under the VMEM budget (v7x-safe when doubled)."""
    def blk(th):
        return 6 * C * th * (Wo + 1) * itemsize
    if blk(Ho) <= budget_bytes:
        return Ho
    cands = [th for th in range(8, Ho, 8)
             if Ho % th == 0 and (th * Wo) % 128 == 0 and blk(th) <= budget_bytes]
    return max(cands) if cands else Ho


def downsample_forward(x_nchw, weight_oihw, bias, time_emb=None, y=None):
    """Equivalent of DownSample.forward: Conv2d(C, C, 3, stride=2, padding=1)."""
    del time_emb, y                                    # unused, as in the module
    N, C, H, W = x_nchw.shape
    Ho = (H + 1) // 2
    Wo = (W + 1) // 2
    dtype = x_nchw.dtype
    itemsize = dtype.itemsize

    # ---- glue (single fused XLA pass): zero-pad + stride-2 phase split,
    #      row-duplicated so spatial tiles need no halo.
    xp = jnp.pad(x_nchw, ((0, 0), (0, 0),
                          (1, 2 * Ho + 1 - H), (1, 2 * Wo + 1 - W)))
    g = xp.reshape(N, C, Ho + 1, 2, Wo + 1, 2)         # [n, c, a, pr, b, pc]
    r0 = g[:, :, 0:Ho, 0]                              # rows 2r      (dy = 0)
    r1 = g[:, :, 0:Ho, 1]                              # rows 2r + 1  (dy = 1)
    r2 = g[:, :, 1:Ho + 1, 0]                          # rows 2r + 2  (dy = 2)
    rph = jnp.stack([r0, r1, r2], axis=1)              # (N, 3, C, Ho, Wo+1, 2)
    rph = jnp.transpose(rph, (0, 1, 5, 2, 3, 4))       # (N, 3, 2, C, Ho, Wo+1)

    # ---- weight repack: (o, i, dy, dx) -> per-row matmul LHS blocks.
    w_t = jnp.transpose(weight_oihw, (2, 0, 3, 1))     # (dy, o, dx, i)
    wA = w_t[:, :, 0:2, :].reshape(3, C, 2 * C)        # [dy][o, pc*C + i]
    wB = w_t[:, :, 2, :]                               # (3, C, C)
    b2d = bias.reshape(C, 1)

    # ---- tile selection and VMEM plan.
    th = _pick_tile_h(Ho, Wo, C, itemsize)
    T = Ho // th
    rph_blk = 6 * C * th * (Wo + 1) * itemsize
    out_blk = C * th * Wo * itemsize
    w_bytes = (6 * C * C + 3 * C * C + C) * itemsize
    acc_bytes = C * th * Wo * 4
    plan = 2 * rph_blk + 2 * out_blk + 2 * w_bytes + 4 * acc_bytes
    vmem_limit = int(min(48 * 2**20, max(16 * 2**20, 2 * plan)))

    out_flat = pl.pallas_call(
        _downsample_conv_kernel,
        out_shape=jax.ShapeDtypeStruct((N, C, Ho * Wo), dtype),
        grid_spec=pltpu.PrefetchScalarGridSpec(
            num_scalar_prefetch=0,
            grid=(N, T),
            in_specs=[
                pl.BlockSpec((1, 3, 2, C, th, Wo + 1),
                             lambda b, t: (b, 0, 0, 0, t, 0)),
                pl.BlockSpec((3, C, 2 * C), lambda b, t: (0, 0, 0)),
                pl.BlockSpec((3, C, C), lambda b, t: (0, 0, 0)),
                pl.BlockSpec((C, 1), lambda b, t: (0, 0)),
            ],
            out_specs=pl.BlockSpec((1, C, th * Wo), lambda b, t: (b, 0, t)),
        ),
        compiler_params=pltpu.CompilerParams(
            dimension_semantics=("parallel", "parallel"),
            vmem_limit_bytes=vmem_limit,
        ),
    )(rph, wA, wB, b2d)

    return out_flat.reshape(N, C, Ho, Wo)              # free (contiguous) reshape


def _reference(x_nchw, weight_oihw, bias):
    out = jax.lax.conv_general_dilated(
        x_nchw, weight_oihw, window_strides=(2, 2), padding=((1, 1), (1, 1)),
        dimension_numbers=("NCHW", "OIHW", "NCHW"))
    return out + bias.reshape(1, -1, 1, 1)


if __name__ == "__main__":
    key = jax.random.PRNGKey(0)
    kx, kw, kb = jax.random.split(key, 3)

    N, C, H, W = 2, 4, 16, 16
    x = jax.random.normal(kx, (N, C, H, W), dtype=jnp.float32)

    # Deterministic Conv2d(in=C, out=C, k=3) parameter init (PyTorch-like bound).
    fan_in = C * 3 * 3
    bound = 1.0 / (fan_in ** 0.5)
    weight = jax.random.uniform(kw, (C, C, 3, 3), jnp.float32, -bound, bound)
    bias = jax.random.uniform(kb, (C,), jnp.float32, -bound, bound)

    fwd = jax.jit(downsample_forward)
    out = fwd(x, weight, bias)
    out = jax.block_until_ready(out)

    ref = _reference(x, weight, bias)
    assert out.shape == ((N, C, (H + 1) // 2, (W + 1) // 2))
    assert jnp.allclose(out, ref, atol=1e-4, rtol=1e-4)

    print("KERNEL_OK")
</pallas_src>

<mosaic_0001>
module attributes {stable_mosaic.version = 11 : i64} {
  func.func @_downsample_conv_kernel(%arg0: i32, %arg1: i32, %arg2: memref<1x3x2x4x8x9xf32, #tpu.memory_space<vmem>>, %arg3: memref<3x4x8xf32, #tpu.memory_space<vmem>>, %arg4: memref<3x4x4xf32, #tpu.memory_space<vmem>>, %arg5: memref<4x1xf32, #tpu.memory_space<vmem>>, %arg6: memref<1x4x64xf32, #tpu.memory_space<vmem>>) attributes {dimension_semantics = [#tpu.dimension_semantics<parallel>, #tpu.dimension_semantics<parallel>], iteration_bounds = array<i64: 2, 1>, scalar_prefetch = 0 : i64, scratch_operands = 0 : i64, tpu.core_type = #tpu.core_type<tc>, window_params = [{transform_indices = @transform_0, window_bounds = array<i64: 1, 3, 2, 4, 8, 9>}, {pipeline_mode = #tpu.pipeline_mode<synchronous>, transform_indices = @transform_1, window_bounds = array<i64: 3, 4, 8>}, {pipeline_mode = #tpu.pipeline_mode<synchronous>, transform_indices = @transform_2, window_bounds = array<i64: 3, 4, 4>}, {pipeline_mode = #tpu.pipeline_mode<synchronous>, transform_indices = @transform_3, window_bounds = array<i64: 4, 1>}, {transform_indices = @transform_4, window_bounds = array<i64: 1, 4, 64>}]} {
    %c0 = arith.constant 0 : index
    %c0_0 = arith.constant 0 : index
    %c0_1 = arith.constant 0 : index
    %c0_2 = arith.constant 0 : index
    %c0_3 = arith.constant 0 : index
    %c0_4 = arith.constant 0 : index
    %0 = vector.load %arg2[%c0, %c0_0, %c0_1, %c0_2, %c0_3, %c0_4] : memref<1x3x2x4x8x9xf32, #tpu.memory_space<vmem>>, vector<1x3x2x4x8x9xf32>
    %1 = vector.shape_cast %0 : vector<1x3x2x4x8x9xf32> to vector<3x2x4x8x9xf32>
    %cst = arith.constant 0.000000e+00 : f32
    %2 = vector.broadcast %cst : f32 to vector<4x64xf32>
    %3 = vector.extract_strided_slice %1 {offsets = [0, 0, 0, 0, 0], sizes = [1, 2, 4, 8, 8], strides = [1, 1, 1, 1, 1]} : vector<3x2x4x8x9xf32> to vector<1x2x4x8x8xf32>
    %4 = vector.shape_cast %3 : vector<1x2x4x8x8xf32> to vector<2x4x8x8xf32>
    %5 = vector.shape_cast %4 : vector<2x4x8x8xf32> to vector<8x64xf32>
    %c0_5 = arith.constant 0 : index
    %c0_6 = arith.constant 0 : index
    %c0_7 = arith.constant 0 : index
    %6 = vector.load %arg3[%c0_5, %c0_6, %c0_7] : memref<3x4x8xf32, #tpu.memory_space<vmem>>, vector<1x4x8xf32>
    %7 = vector.shape_cast %6 : vector<1x4x8xf32> to vector<4x8xf32>
    %cst_8 = arith.constant dense<0.000000e+00> : vector<4x64xf32>
    %8 = tpu.matmul %7, %5, %cst_8 {dimension_numbers = #tpu.dot_dimension_numbers<[1], [0], [0], [1], [0, 0, 1, 1], [], []>} : vector<4x8xf32>, vector<8x64xf32>, vector<4x64xf32> -> vector<4x64xf32>
    %9 = arith.addf %2, %8 : vector<4x64xf32>
    %10 = vector.extract_strided_slice %1 {offsets = [0, 0, 0, 0, 1], sizes = [1, 1, 4, 8, 8], strides = [1, 1, 1, 1, 1]} : vector<3x2x4x8x9xf32> to vector<1x1x4x8x8xf32>
    %11 = vector.shape_cast %10 : vector<1x1x4x8x8xf32> to vector<4x8x8xf32>
    %12 = vector.shape_cast %11 : vector<4x8x8xf32> to vector<4x64xf32>
    %c0_9 = arith.constant 0 : index
    %c0_10 = arith.constant 0 : index
    %c0_11 = arith.constant 0 : index
    %13 = vector.load %arg4[%c0_9, %c0_10, %c0_11] : memref<3x4x4xf32, #tpu.memory_space<vmem>>, vector<1x4x4xf32>
    %14 = vector.shape_cast %13 : vector<1x4x4xf32> to vector<4x4xf32>
    %cst_12 = arith.constant dense<0.000000e+00> : vector<4x64xf32>
    %15 = tpu.matmul %14, %12, %cst_12 {dimension_numbers = #tpu.dot_dimension_numbers<[1], [0], [0], [1], [0, 0, 1, 1], [], []>} : vector<4x4xf32>, vector<4x64xf32>, vector<4x64xf32> -> vector<4x64xf32>
    %16 = arith.addf %9, %15 : vector<4x64xf32>
    %17 = vector.extract_strided_slice %1 {offsets = [1, 0, 0, 0, 0], sizes = [1, 2, 4, 8, 8], strides = [1, 1, 1, 1, 1]} : vector<3x2x4x8x9xf32> to vector<1x2x4x8x8xf32>
    %18 = vector.shape_cast %17 : vector<1x2x4x8x8xf32> to vector<2x4x8x8xf32>
    %19 = vector.shape_cast %18 : vector<2x4x8x8xf32> to vector<8x64xf32>
    %c1 = arith.constant 1 : index
    %c0_13 = arith.constant 0 : index
    %c0_14 = arith.constant 0 : index
    %20 = vector.load %arg3[%c1, %c0_13, %c0_14] : memref<3x4x8xf32, #tpu.memory_space<vmem>>, vector<1x4x8xf32>
    %21 = vector.shape_cast %20 : vector<1x4x8xf32> to vector<4x8xf32>
    %cst_15 = arith.constant dense<0.000000e+00> : vector<4x64xf32>
    %22 = tpu.matmul %21, %19, %cst_15 {dimension_numbers = #tpu.dot_dimension_numbers<[1], [0], [0], [1], [0, 0, 1, 1], [], []>} : vector<4x8xf32>, vector<8x64xf32>, vector<4x64xf32> -> vector<4x64xf32>
    %23 = arith.addf %16, %22 : vector<4x64xf32>
    %24 = vector.extract_strided_slice %1 {offsets = [1, 0, 0, 0, 1], sizes = [1, 1, 4, 8, 8], strides = [1, 1, 1, 1, 1]} : vector<3x2x4x8x9xf32> to vector<1x1x4x8x8xf32>
    %25 = vector.shape_cast %24 : vector<1x1x4x8x8xf32> to vector<4x8x8xf32>
    %26 = vector.shape_cast %25 : vector<4x8x8xf32> to vector<4x64xf32>
    %c1_16 = arith.constant 1 : index
    %c0_17 = arith.constant 0 : index
    %c0_18 = arith.constant 0 : index
    %27 = vector.load %arg4[%c1_16, %c0_17, %c0_18] : memref<3x4x4xf32, #tpu.memory_space<vmem>>, vector<1x4x4xf32>
    %28 = vector.shape_cast %27 : vector<1x4x4xf32> to vector<4x4xf32>
    %cst_19 = arith.constant dense<0.000000e+00> : vector<4x64xf32>
    %29 = tpu.matmul %28, %26, %cst_19 {dimension_numbers = #tpu.dot_dimension_numbers<[1], [0], [0], [1], [0, 0, 1, 1], [], []>} : vector<4x4xf32>, vector<4x64xf32>, vector<4x64xf32> -> vector<4x64xf32>
    %30 = arith.addf %23, %29 : vector<4x64xf32>
    %31 = vector.extract_strided_slice %1 {offsets = [2, 0, 0, 0, 0], sizes = [1, 2, 4, 8, 8], strides = [1, 1, 1, 1, 1]} : vector<3x2x4x8x9xf32> to vector<1x2x4x8x8xf32>
    %32 = vector.shape_cast %31 : vector<1x2x4x8x8xf32> to vector<2x4x8x8xf32>
    %33 = vector.shape_cast %32 : vector<2x4x8x8xf32> to vector<8x64xf32>
    %c2 = arith.constant 2 : index
    %c0_20 = arith.constant 0 : index
    %c0_21 = arith.constant 0 : index
    %34 = vector.load %arg3[%c2, %c0_20, %c0_21] : memref<3x4x8xf32, #tpu.memory_space<vmem>>, vector<1x4x8xf32>
    %35 = vector.shape_cast %34 : vector<1x4x8xf32> to vector<4x8xf32>
    %cst_22 = arith.constant dense<0.000000e+00> : vector<4x64xf32>
    %36 = tpu.matmul %35, %33, %cst_22 {dimension_numbers = #tpu.dot_dimension_numbers<[1], [0], [0], [1], [0, 0, 1, 1], [], []>} : vector<4x8xf32>, vector<8x64xf32>, vector<4x64xf32> -> vector<4x64xf32>
    %37 = arith.addf %30, %36 : vector<4x64xf32>
    %38 = vector.extract_strided_slice %1 {offsets = [2, 0, 0, 0, 1], sizes = [1, 1, 4, 8, 8], strides = [1, 1, 1, 1, 1]} : vector<3x2x4x8x9xf32> to vector<1x1x4x8x8xf32>
    %39 = vector.shape_cast %38 : vector<1x1x4x8x8xf32> to vector<4x8x8xf32>
    %40 = vector.shape_cast %39 : vector<4x8x8xf32> to vector<4x64xf32>
    %c2_23 = arith.constant 2 : index
    %c0_24 = arith.constant 0 : index
    %c0_25 = arith.constant 0 : index
    %41 = vector.load %arg4[%c2_23, %c0_24, %c0_25] : memref<3x4x4xf32, #tpu.memory_space<vmem>>, vector<1x4x4xf32>
    %42 = vector.shape_cast %41 : vector<1x4x4xf32> to vector<4x4xf32>
    %cst_26 = arith.constant dense<0.000000e+00> : vector<4x64xf32>
    %43 = tpu.matmul %42, %40, %cst_26 {dimension_numbers = #tpu.dot_dimension_numbers<[1], [0], [0], [1], [0, 0, 1, 1], [], []>} : vector<4x4xf32>, vector<4x64xf32>, vector<4x64xf32> -> vector<4x64xf32>
    %44 = arith.addf %37, %43 : vector<4x64xf32>
    %c0_27 = arith.constant 0 : index
    %c0_28 = arith.constant 0 : index
    %45 = vector.load %arg5[%c0_27, %c0_28] : memref<4x1xf32, #tpu.memory_space<vmem>>, vector<4x1xf32>
    %46 = vector.broadcast %45 : vector<4x1xf32> to vector<4x64xf32>
    %47 = arith.addf %44, %46 : vector<4x64xf32>
    %c0_29 = arith.constant 0 : index
    %c0_30 = arith.constant 0 : index
    %c0_31 = arith.constant 0 : index
    %48 = vector.load %arg6[%c0_29, %c0_30, %c0_31] : memref<1x4x64xf32, #tpu.memory_space<vmem>>, vector<1x4x64xf32>
    %49 = vector.shape_cast %48 : vector<1x4x64xf32> to vector<4x64xf32>
    %50 = vector.shape_cast %47 : vector<4x64xf32> to vector<1x4x64xf32>
    tpu.vector_store %arg6[%c0_29, %c0_30, %c0_31], %50 {strides = array<i32>} : memref<1x4x64xf32, #tpu.memory_space<vmem>>, vector<1x4x64xf32>,
    return
  }
  func.func @transform_0(%arg0: i32, %arg1: i32) -> (i32, i32, i32, i32, i32, i32) {
    %c0_i32 = arith.constant 0 : i32
    %c0_i32_0 = arith.constant 0 : i32
    %c0_i32_1 = arith.constant 0 : i32
    %c0_i32_2 = arith.constant 0 : i32
    %c0_i32_3 = arith.constant 0 : i32
    return %arg0, %c0_i32, %c0_i32_0, %c0_i32_1, %arg1, %c0_i32_2 : i32, i32, i32, i32, i32, i32
  }
  func.func @transform_1(%arg0: i32, %arg1: i32) -> (i32, i32, i32) {
    %c0_i32 = arith.constant 0 : i32
    %c0_i32_0 = arith.constant 0 : i32
    %c0_i32_1 = arith.constant 0 : i32
    %c0_i32_2 = arith.constant 0 : i32
    return %c0_i32, %c0_i32_0, %c0_i32_1 : i32, i32, i32
  }
  func.func @transform_2(%arg0: i32, %arg1: i32) -> (i32, i32, i32) {
    %c0_i32 = arith.constant 0 : i32
    %c0_i32_0 = arith.constant 0 : i32
    %c0_i32_1 = arith.constant 0 : i32
    %c0_i32_2 = arith.constant 0 : i32
    return %c0_i32, %c0_i32_0, %c0_i32_1 : i32, i32, i32
  }
  func.func @transform_3(%arg0: i32, %arg1: i32) -> (i32, i32) {
    %c0_i32 = arith.constant 0 : i32
    %c0_i32_0 = arith.constant 0 : i32
    %c0_i32_1 = arith.constant 0 : i32
    return %c0_i32, %c0_i32_0 : i32, i32
  }
  func.func @transform_4(%arg0: i32, %arg1: i32) -> (i32, i32, i32) {
    %c0_i32 = arith.constant 0 : i32
    %c0_i32_0 = arith.constant 0 : i32
    return %arg0, %c0_i32, %arg1 : i32, i32, i32
  }
}

</mosaic_0001>

<bundles_post_ra>
// kernel: downsample_forward.1
= control target key start
LH: loop header
LB: loop body
LE: loop exit
PB: predicated region body
PF: predicated region fallthrough
CT: control target
= control target key end

     0   :  { %s1872_s15 = smov 0   ;;  %s1874_s16 = smov 0   ;;  %s2349_s0 = inlined_call_operand.vmem [shape: f32[2,3,2,4,8,9], index: 0, kind: input, shape index: {}]   ;;  %s2350_s1 = inlined_call_operand.vmem [shape: f32[3,4,8], index: 1, kind: input, shape index: {}]   ;;  %s2351_s2 = inlined_call_operand.vmem [shape: f32[3,4,4], index: 2, kind: input, shape index: {}]   ;;  %s2352_s3 = inlined_call_operand.vmem [shape: f32[4,1], index: 3, kind: input, shape index: {}]   ;;  %s2353_s4 = inlined_call_operand.vmem [shape: f32[2,4,64], index: 4, kind: output, shape index: {}]  }
   0x1   :  { %s1876_s17 = smov 0  }
   0x2 LB: > { %s26_s18 = sadd.s32 1, %s1828_s16  ;;  %p1681_p0 = scmp.ge.s32.totalorder %s1832_s17, 1  ;;  %s1832_s17 = sphi %s1876_s17, %s14_s17   ;;  %s1828_s16 = sphi %s1874_s16, %s2355_s16   ;;  %s1824_s15 = sphi %s1872_s15, %s2354_s15  }
   0x3   : > { %p28_p1 = scmp.ge.s32.totalorder %s26_s18, 2  ;;  %p181_p2 = scmp.lt.s32.totalorder %s1832_s17, 3 }
   0x5   : > { %s2357_s18 = smov (%p28_p1, %s26_s18), 0  ;;  %p182_p3 = pnand %p1681_p0, %p181_p2 }
   0x6   : > { %p212_p4 = scmp.lt.s32.totalorder (!%p182_p3), %s1824_s15, 1  ;;  %v1834_v0 = vmov (!%p182_p3), 1983009808   ;;  %v256_v2 = vlaneseq (!%p182_p3)  ;;  %s1835_s23 = smov (!%p182_p3), 127   ;;  %v1836_v9 = vmov (!%p182_p3), 1934713408  }
   0x7   : > { %185 = sbr.rel (%p182_p3) target bundleno = 540 (0x21c), region = 36  ;;  %v254_v1 = vunpack.c.l.s4 (!%p182_p3), %v1834_v0  ;;  %v318_v10 = vunpack.c.l.s4 (!%p182_p3), %v1836_v9  ;;  %v1837_v11 = vmov (!%p182_p3), 0.0   ;;  %s1838_s24 = smov (!%p182_p3), 8   ;;  %vm415_vm0 = vcmask (!%p182_p3), 64512  }
   0x8   : > { %v257_v4 = vshrl.u32 (!%p182_p3), %v256_v2, 7  ;;  %1716 = vmatprep.subr.mxu1 (!%p182_p3), %v1837_v11  ;;  %1711 = vmatprep.subr.mxu0 (!%p182_p3), %v1837_v11  ;;  %s1839_s25 = smov (!%p182_p3), 32   ;;  %s1840_s26 = smov (!%p182_p3), 16   ;;  %vm417_vm1 = vcmask (!%p182_p3), 130048   ;;  %vm1845_vm2 = vmmov (!%p182_p3), 0   ;;  %vm419_vm3 = vcmask (!%p182_p3), 195584  }
   0x9   : > { %v255_v3 = vunpack.c.0.s8 (!%p182_p3), %v254_v1  ;;  %v319_v20 = vunpack.c.0.s8 (!%p182_p3), %v318_v10  ;;  %s1841_s27 = smov (!%p182_p3), 24   ;;  %s1842_s28 = smov (!%p182_p3), 56   ;;  %1713 = vmatprep.mubr.msk.f32.mxu0 (!%p182_p3), %vm1845_vm2, %v1837_v11  ;;  %1718 = vmatprep.mubr.msk.f32.mxu1 (!%p182_p3), %vm1845_vm2, %v1837_v11  ;;  %vm421_vm4 = vcmask (!%p182_p3), 261120   ;;  %vm423_vm5 = vcmask (!%p182_p3), 326656  }
   0xa   : > { %s1843_s29 = smov (!%p182_p3), 40   ;;  %s1844_s30 = smov (!%p182_p3), 48   ;;  %vm425_vm6 = vcmask (!%p182_p3), 392192   ;;  %vm427_vm7 = vcmask (!%p182_p3), 457728   ;;  %vm554_vm8 = vcmask (!%p182_p3), 1043456   ;;  %vm550_vm9 = vcmask (!%p182_p3), 31744  }
   0xb   : > { %v1906_v12 = vsub.s32 (!%p182_p3), %v255_v3, %v257_v4  ;;  %v1927_v34 = vsub.s32 (!%p182_p3), %v319_v20, %v257_v4  ;;  %vm1598_vm10 = vcmask (!%p182_p3), 519168  }
   0xe   : > { %s2359_s15 = smov (!%p212_p4, %s1824_s15), 1 }
   0xf   : > { %s1741_s19 = smul.u32 192, %s2359_s15 }
  0x11   : > { %s1896_s22 = scalar_lea.vmem %s2349_s0, %s1741_s19 }
  0x12   : > { %v229_v5 = vld [vmem:[%s1896_s22 + $0x10] sm:$0xff]  ;;  %v227_v6 = vld [vmem:[%s1896_s22] sm:$0xff]  ;;  %v230_v7 = vld [vmem:[%s1896_s22 + $0x18] sm:$0xff] }
  0x13   : > { %438 = vrot.lane.b32.xlu1 %v229_v5, %s1835_s23  ;;  %434 = vrot.lane.b32.xlu0 %v227_v6, %s1835_s23  ;;  %v228_v8 = vld [vmem:[%s1896_s22 + $0x8] sm:$0xff]  ;;  %v251_v13 = vcombine.low %v227_v6, %v229_v5  ;;  %v235_v16 = vld [vmem:[%s1896_s22 + $0x40] sm:$0xff]  ;;  %v252_v17 = vcombine.high %v227_v6, %v229_v5 }
  0x14   : > { %v267_v14 = vcombine.low %v228_v8, %v230_v7  ;;  %v236_v15 = vld [vmem:[%s1896_s22 + $0x48] sm:$0xff]  ;;  %v1792_v18 = vld [vmem:[%s1896_s22 + $0x20] ss:$16 sps:$4 sm:$0xff]   ;;  %v268_v22 = vcombine.high %v228_v8, %v230_v7  ;;  %v238_v24 = vld [vmem:[%s1896_s22 + $0x58] sm:$0xff] }
  0x15   : > { %v1794_v19 = vld [vmem:[%s1896_s22 + $0x28] ss:$16 sps:$4 sm:$0xff]   ;;  %v259_v21 = vrot.slane %v251_v13, %v1906_v12  ;;  %v291_v25 = vrot.slane %v1792_v18, %v1906_v12  ;;  %v1800_v27 = vld [vmem:[%s1896_s22 + $0x24] ss:$16 sps:$4 sm:$0xff]   ;;  %v717_v28 = vcombine.low %v236_v15, %v238_v24  ;;  %v1801_v30 = vld [vmem:[%s1896_s22 + $0x2c] ss:$16 sps:$4 sm:$0xff]   ;;  %v1925_v31 = vrot.slane %v252_v17, %v1906_v12 }
  0x16   : > { %v275_v23 = vrot.slane %v267_v14, %v1906_v12  ;;  %v307_v26 = vrot.slane %v1794_v19, %v1906_v12  ;;  %v237_v29 = vld [vmem:[%s1896_s22 + $0x50] sm:$0xff]  ;;  %v718_v32 = vcombine.high %v236_v15, %v238_v24  ;;  %v1930_v35 = vrot.slane %v268_v22, %v1906_v12  ;;  %v244_v36 = vld [vmem:[%s1896_s22 + $0x88] sm:$0xff]  ;;  %v1934_v37 = vld [vmem:[%s1896_s22 + $0x80] sm:$0xff] }
  0x17   : > { %440 = vrot.lane.b32.xlu1 %v230_v7, %s1835_s23  ;;  %436 = vrot.lane.b32.xlu0 %v228_v8, %s1835_s23  ;;  %v701_v33 = vcombine.low %v235_v16, %v237_v29  ;;  %v246_v38 = vld [vmem:[%s1896_s22 + $0x98] sm:$0xff]  ;;  %v1938_v40 = vrot.slane %v1800_v27, %v1906_v12  ;;  %v1941_v41 = vrot.slane %v1801_v30, %v1906_v12  ;;  %v245_v42 = vld [vmem:[%s1896_s22 + $0x90] sm:$0xff] }
  0x18   : > { %v315_v39 = vcombine.low %v259_v21, %v275_v23  ;;  %v347_v43 = vcombine.low %v291_v25, %v307_v26  ;;  %v1796_v44 = vld [vmem:[%s1896_s22 + $0x60] ss:$16 sps:$4 sm:$0xff]   ;;  %v1798_v45 = vld [vmem:[%s1896_s22 + $0x68] ss:$16 sps:$4 sm:$0xff]   ;;  %v1947_v46 = vrot.slane %v717_v28, %v1906_v12  ;;  %v702_v47 = vcombine.high %v235_v16, %v237_v29  ;;  %v1802_v48 = vld [vmem:[%s1896_s22 + $0x64] ss:$16 sps:$4 sm:$0xff]  }
  0x19   : > { %v1803_v49 = vld [vmem:[%s1896_s22 + $0x6c] ss:$16 sps:$4 sm:$0xff]   ;;  %v1954_v50 = vrot.slane %v718_v32, %v1906_v12  ;;  %v709_v51 = vrot.slane %v701_v33, %v1906_v12  ;;  %v1163_v52 = vcombine.high %v244_v36, %v246_v38  ;;  %v1147_v53 = vcombine.high %v1934_v37, %v245_v42  ;;  %v1808_v13 = vld [vmem:[%s1896_s22 + $0xa4] ss:$16 sps:$4 sm:$0xff]  }
  0x1a   : > { %v1959_v54 = vrot.slane %v315_v39, %v1927_v34  ;;  %v316_v55 = vcombine.high %v259_v21, %v275_v23  ;;  %v331_v56 = vcombine.low %v1925_v31, %v1930_v35  ;;  %v363_v57 = vcombine.low %v1938_v40, %v1941_v41  ;;  %v1809_v14 = vld [vmem:[%s1896_s22 + $0xac] ss:$16 sps:$4 sm:$0xff]  }
  0x1b   : > { %954 = vrot.lane.b32.xlu1 %v236_v15, %s1835_s23  ;;  %952 = vrot.lane.b32.xlu0 %v235_v16, %s1835_s23  ;;  %v1966_v58 = vrot.slane %v347_v43, %v1927_v34  ;;  %v348_v59 = vcombine.high %v291_v25, %v307_v26  ;;  %v741_v60 = vrot.slane %v1796_v44, %v1906_v12  ;;  %v1804_v43 = vld [vmem:[%s1896_s22 + $0xa0] ss:$16 sps:$4 sm:$0xff]   ;;  %v1806_v44 = vld [vmem:[%s1896_s22 + $0xa8] ss:$16 sps:$4 sm:$0xff]  }
  0x1c   : > { %v757_v61 = vrot.slane %v1798_v45, %v1906_v12  ;;  %v1971_v62 = vrot.slane %v702_v47, %v1906_v12  ;;  %v1977_v63 = vrot.slane %v1802_v48, %v1906_v12  ;;  %v1980_v0 = vrot.slane %v1803_v49, %v1906_v12 }
  0x1d   : > { %v766_v1 = vcombine.high %v709_v51, %v1947_v46  ;;  %v1162_v3 = vcombine.low %v244_v36, %v246_v38  ;;  %v1177_v4 = vrot.slane %v1163_v52, %v1906_v12  ;;  %v1985_v5 = vrot.slane %v331_v56, %v1927_v34 }
  0x1e   : > { %v798_v2 = vcombine.high %v741_v60, %v757_v61  ;;  %v1988_v6 = vrot.slane %v363_v57, %v1927_v34  ;;  %v1161_v7 = vrot.slane %v1147_v53, %v1906_v12  ;;  %v380_v8 = vcombine.high %v1959_v54, %v1966_v58 }
  0x1f   : > { %958 = vrot.lane.b32.xlu1 %v238_v24, %s1835_s23  ;;  %956 = vrot.lane.b32.xlu0 %v237_v29, %s1835_s23  ;;  %v330_v9 = vrot.slane %v316_v55, %v1927_v34  ;;  %v362_v10 = vrot.slane %v348_v59, %v1927_v34  ;;  %v781_v16 = vcombine.low %v1971_v62, %v1954_v50 }
  0x20   : > { %v383_v15 = vcombine.low %v1985_v5, %v1988_v6  ;;  %v813_v17 = vcombine.low %v1977_v63, %v1980_v0  ;;  %v1146_v18 = vcombine.low %v1934_v37, %v245_v42  ;;  %v2007_v19 = vrot.slane %v766_v1, %v1927_v34 }
  0x21   : > { %v2010_v20 = vrot.slane %v798_v2, %v1927_v34  ;;  %v2013_v21 = vrot.slane %v1162_v3, %v1906_v12  ;;  %v765_v22 = vcombine.low %v709_v51, %v1947_v46  ;;  %v797_v23 = vcombine.low %v741_v60, %v757_v61 }
  0x22   : > { %v381_v24 = vcombine.low %v330_v9, %v362_v10  ;;  %v1193_v26 = vrot.slane %v1808_v13, %v1906_v12  ;;  %v1209_v27 = vrot.slane %v1809_v14, %v1906_v12  ;;  %v2023_v28 = vrot.slane %v781_v16, %v1927_v34 }
  0x23   : > { %1399 = vrot.lane.b32.xlu1 %v244_v36, %s1835_s23  ;;  %1397 = vrot.lane.b32.xlu0 %v1934_v37, %s1835_s23  ;;  %v831_v25 = vcombine.low %v2007_v19, %v2010_v20  ;;  %v2026_v29 = vrot.slane %v813_v17, %v1927_v34  ;;  %v1226_v30 = vcombine.low %v1161_v7, %v1177_v4 }
  0x24   : > { %v1154_v32 = vrot.slane %v1146_v18, %v1906_v12  ;;  %v332_v33 = vcombine.high %v1925_v31, %v1930_v35  ;;  %v364_v36 = vcombine.high %v1938_v40, %v1941_v41  ;;  %v1258_v37 = vcombine.low %v1193_v26, %v1209_v27 }
  0x25   : > { %v2034_v39 = vrot.slane %v765_v22, %v1927_v34  ;;  %v1227_v45 = vcombine.high %v1161_v7, %v1177_v4  ;;  %v782_v46 = vcombine.high %v1971_v62, %v1954_v50  ;;  %v2044_v47 = vrot.slane %v1226_v30, %v1927_v34 }
  0x26   : > { %v2047_v31 = vrot.slane %v1258_v37, %v1927_v34  ;;  %v1259_v35 = vcombine.high %v1193_v26, %v1209_v27  ;;  %v833_v40 = vcombine.low %v2023_v28, %v2026_v29  ;;  %v814_v41 = vcombine.high %v1977_v63, %v1980_v0 }
  0x27   : > { %1403 = vrot.lane.b32.xlu1 %v246_v38, %s1835_s23  ;;  %1401 = vrot.lane.b32.xlu0 %v245_v42, %s1835_s23  ;;  %v382_v38 = vcombine.high %v330_v9, %v362_v10  ;;  %v2037_v42 = vrot.slane %v797_v23, %v1927_v34  ;;  %v2056_v48 = vrot.slane %v1227_v45, %v1927_v34  ;;  %s1683_s23 = sshll.u32 %s2359_s15, 2 }
  0x28   : > { %v346_v49 = vrot.slane %v332_v33, %v1927_v34  ;;  %v378_v50 = vrot.slane %v364_v36, %v1927_v34  ;;  %v1279_v51 = vcombine.high %v2044_v47, %v2047_v31  ;;  %v2063_v52 = vrot.slane %v1259_v35, %v1927_v34 }
  0x29   : > { %v1186_v53 = vrot.slane %v1804_v43, %v1906_v12  ;;  %v1202_v55 = vrot.slane %v1806_v44, %v1906_v12  ;;  %v830_v56 = vcombine.high %v2034_v39, %v2037_v42  ;;  %v1211_v59 = vcombine.high %v1154_v32, %v2013_v21 }
  0x2a   : > { %v386_v57 = vcombine.high %v346_v49, %v378_v50  ;;  %v1280_v60 = vcombine.low %v2056_v48, %v2063_v52  ;;  %v796_v61 = vrot.slane %v782_v46, %v1927_v34  ;;  %v828_v62 = vrot.slane %v814_v41, %v1927_v34 }
  0x2b   : > { %388 = vrot.lane.b32.xlu0 %v380_v8, %s1838_s24  ;;  %400 = vrot.lane.b32.xlu1 %v383_v15, %s1839_s25  ;;  %v1243_v63 = vcombine.high %v1186_v53, %v1202_v55  ;;  %v1281_v0 = vcombine.high %v2056_v48, %v2063_v52  ;;  %v384_v1 = vcombine.high %v1985_v5, %v1988_v6  ;;  %v1591_v52 = vld [vmem:[%s2352_s3] sm:$0xf] }
  0x2c   : > { %v835_v2 = vcombine.low %v796_v61, %v828_v62  ;;  %v1225_v3 = vrot.slane %v1211_v59, %v1927_v34  ;;  %v832_v7 = vcombine.high %v2007_v19, %v2010_v20  ;;  %v385_v6 = vcombine.low %v346_v49, %v378_v50 }
  0x2d   : > { %v1257_v4 = vrot.slane %v1243_v63, %v1927_v34  ;;  %v1210_v8 = vcombine.low %v1154_v32, %v2013_v21  ;;  %v1242_v9 = vcombine.low %v1186_v53, %v1202_v55  ;;  %v1278_v10 = vcombine.low %v2044_v47, %v2047_v31 }
  0x2e   : > { %v834_v13 = vcombine.high %v2023_v28, %v2026_v29  ;;  %v836_v17 = vcombine.high %v796_v61, %v828_v62  ;;  %v379_v18 = vcombine.low %v1959_v54, %v1966_v58  ;;  %v829_v20 = vcombine.low %v2034_v39, %v2037_v42 }
  0x2f   : > { %392 = vrot.lane.b32.xlu0 %v381_v24, %s1840_s26  ;;  %842 = vrot.lane.b32.xlu1 %v831_v25, %s1840_s26  ;;  %v1276_v5 = vcombine.low %v1225_v3, %v1257_v4  ;;  %v2097_v14 = vrot.slane %v1210_v8, %v1927_v34  ;;  %v2100_v15 = vrot.slane %v1242_v9, %v1927_v34 }
  0x30   : > { %v1277_v19 = vcombine.high %v1225_v3, %v1257_v4 }
  0x31   : > { %v1275_v16 = vcombine.high %v2097_v14, %v2100_v15  ;;  %v1274_v21 = vcombine.low %v2097_v14, %v2100_v15 }
  0x33   : > { %396 = vrot.lane.b32.xlu0 %v382_v38, %s1841_s27  ;;  %850 = vrot.lane.b32.xlu1 %v833_v40, %s1839_s25 }
  0x37   : > { %838 = vrot.lane.b32.xlu0 %v830_v56, %s1838_s24  ;;  %412 = vrot.lane.b32.xlu1 %v386_v57, %s1842_s28 }
  0x3b   : > { %404 = vrot.lane.b32.xlu0 %v384_v1, %s1843_s29  ;;  %858 = vrot.lane.b32.xlu1 %v835_v2, %s1844_s30 }
  0x3f   : > { %846 = vrot.lane.b32.xlu0 %v832_v7, %s1841_s27  ;;  %1287 = vrot.lane.b32.xlu1 %v1276_v5, %s1840_s26 }
  0x43   : > { %408 = vrot.lane.b32.xlu0 %v385_v6, %s1844_s30  ;;  %1295 = vrot.lane.b32.xlu1 %v1278_v10, %s1839_s25 }
  0x47   : > { %854 = vrot.lane.b32.xlu0 %v834_v13, %s1843_s29 }
  0x4b   : > { %1283 = vrot.lane.b32.xlu0 %v1275_v16, %s1838_s24 }
  0x4f   : > { %862 = vrot.lane.b32.xlu0 %v836_v17, %s1842_s28 }
  0x53   : > { %1291 = vrot.lane.b32.xlu0 %v1277_v19, %s1841_s27 }
  0x85   : > { %v439_v22 = vpop.permute.xlu1 %438  ;;  %v435_v23 = vpop.permute.xlu0 %434 }
  0x86   : > { %v446_v24 = vcombine.low %v435_v23, %v439_v22  ;;  %v447_v25 = vcombine.high %v435_v23, %v439_v22 }
  0x88   : > { %v454_v30 = vrot.slane %v446_v24, %v1906_v12  ;;  %v461_v32 = vrot.slane %v447_v25, %v1906_v12 }
  0x89   : > { %v441_v26 = vpop.permute.xlu1 %440  ;;  %v437_v27 = vpop.permute.xlu0 %436 }
  0x8a   : > { %v462_v28 = vcombine.low %v437_v27, %v441_v26  ;;  %v463_v29 = vcombine.high %v437_v27, %v441_v26 }
  0x8c   : > { %v470_v33 = vrot.slane %v462_v28, %v1906_v12  ;;  %v477_v36 = vrot.slane %v463_v29, %v1906_v12 }
  0x8d   : > { %v955_v37 = vpop.permute.xlu1 %954  ;;  %v953_v38 = vpop.permute.xlu0 %952 }
  0x8e   : > { %v479_v43 = vcombine.high %v454_v30, %v470_v33  ;;  %v495_v44 = vcombine.high %v461_v32, %v477_v36  ;;  %v494_v45 = vcombine.low %v461_v32, %v477_v36  ;;  %v478_v26 = vcombine.low %v454_v30, %v470_v33 }
  0x90   : > { %v493_v46 = vrot.slane %v479_v43, %v1927_v34  ;;  %v2121_v35 = vrot.slane %v495_v44, %v1927_v34  ;;  %v502_v56 = vrot.slane %v494_v45, %v1927_v34  ;;  %v2173_v33 = vrot.slane %v478_v26, %v1927_v34 }
  0x91   : > { %v959_v40 = vpop.permute.xlu1 %958  ;;  %v957_v41 = vpop.permute.xlu0 %956 }
  0x92   : > { %v980_v49 = vcombine.low %v955_v37, %v959_v40  ;;  %v981_v50 = vcombine.high %v955_v37, %v959_v40  ;;  %v964_v53 = vcombine.low %v953_v38, %v957_v41  ;;  %v965_v55 = vcombine.high %v953_v38, %v957_v41  ;;  %519 = vrot.lane.b32.xlu1 %v493_v46, %s1840_s26 }
  0x93   : > { %535 = vrot.lane.b32.xlu0 %v2121_v35, %s1844_s30  ;;  %v511_v36 = vcombine.high %v493_v46, %v1837_v11  ;;  %v512_v44 = vcombine.high %v502_v56, %v1837_v11  ;;  %v510_v45 = vcombine.high %v2173_v33, %v1837_v11  ;;  %v513_v41 = vcombine.high %v2121_v35, %v1837_v11 }
  0x94   : > { %v988_v57 = vrot.slane %v980_v49, %v1906_v12  ;;  %v995_v59 = vrot.slane %v981_v50, %v1906_v12  ;;  %v972_v61 = vrot.slane %v964_v53, %v1906_v12  ;;  %v979_v62 = vrot.slane %v965_v55, %v1906_v12 }
  0x95   : > { %v1400_v63 = vpop.permute.xlu1 %1399  ;;  %v1398_v1 = vpop.permute.xlu0 %1397 }
  0x96   : > { %v997_v2 = vcombine.high %v972_v61, %v988_v57  ;;  %527 = vrot.lane.b32.xlu1 %v502_v56, %s1839_s25  ;;  %v1012_v3 = vcombine.low %v979_v62, %v995_v59  ;;  %v1013_v13 = vcombine.high %v979_v62, %v995_v59  ;;  %v996_v43 = vcombine.low %v972_v61, %v988_v57  ;;  %v429_v62 = vld [vmem:[%s2350_s1] sm:$0xf] }
  0x98   : > { %v2133_v4 = vrot.slane %v997_v2, %v1927_v34  ;;  %v2138_v16 = vrot.slane %v1012_v3, %v1927_v34  ;;  %v2162_v29 = vrot.slane %v1013_v13, %v1927_v34  ;;  %v2200_v49 = vrot.slane %v996_v43, %v1927_v34 }
  0x99   : > { %v1404_v7 = vpop.permute.xlu1 %1403  ;;  %v1402_v5 = vpop.permute.xlu0 %1401 }
  0x9a   : > { %v1425_v6 = vcombine.low %v1400_v63, %v1404_v7  ;;  %v1426_v8 = vcombine.high %v1400_v63, %v1404_v7  ;;  %v1409_v9 = vcombine.low %v1398_v1, %v1402_v5  ;;  %v1410_v10 = vcombine.high %v1398_v1, %v1402_v5  ;;  %1037 = vrot.lane.b32.xlu0 %v2133_v4, %s1840_s26 }
  0x9b   : > { %v1028_v42 = vcombine.high %v2200_v49, %v1837_v11  ;;  %v1029_v57 = vcombine.high %v2133_v4, %v1837_v11  ;;  %v1030_v1 = vcombine.high %v2138_v16, %v1837_v11  ;;  %v1846_v4 = vmov 0  }
  0x9c   : > { %v2141_v17 = vrot.slane %v1425_v6, %v1906_v12  ;;  %v2144_v19 = vrot.slane %v1426_v8, %v1906_v12  ;;  %v2147_v22 = vrot.slane %v1409_v9, %v1906_v12  ;;  %v2150_v23 = vrot.slane %v1410_v10, %v1906_v12  ;;  %1779 = vset.pattern.permute.xlu0 %v1846_v4 }
  0x9d   : > { %v389_v24 = vpop.permute.xlu0 %388  ;;  %v401_v12 = vpop.permute.xlu1 %400 }
  0x9e   : > { %v1457_v25 = vcombine.low %v2150_v23, %v2144_v19  ;;  %1045 = vrot.lane.b32.xlu0 %v2138_v16, %s1839_s25  ;;  %v1442_v27 = vcombine.high %v2147_v22, %v2141_v17  ;;  %v416_v38 = vsel %vm415_vm0, %v379_v18, %v389_v24  ;;  %v1458_v56 = vcombine.high %v2150_v23, %v2144_v19 }
  0xa0   : > { %v2159_v28 = vrot.slane %v1457_v25, %v1927_v34  ;;  %v2170_v30 = vrot.slane %v1442_v27, %v1927_v34  ;;  %v1472_v2 = vrot.slane %v1458_v56, %v1927_v34 }
  0xa1   : > { %v393_v32 = vpop.permute.xlu0 %392  ;;  %v843_v46 = vpop.permute.xlu1 %842 }
  0xa2   : > { %1490 = vrot.lane.b32.xlu1 %v2159_v28, %s1839_s25  ;;  %1053 = vrot.lane.b32.xlu0 %v2162_v29, %s1844_s30  ;;  %v418_v54 = vsel %vm417_vm1, %v416_v38, %v393_v32  ;;  %v1475_v7 = vcombine.high %v2159_v28, %v1837_v11  ;;  %v1476_v5 = vcombine.high %v1472_v2, %v1837_v11 }
  0xa5   : > { %v397_v37 = vpop.permute.xlu0 %396  ;;  %v851_v39 = vpop.permute.xlu1 %850 }
  0xa6   : > { %523 = vrot.lane.b32.xlu1 %v511_v36, %s1841_s27  ;;  %1482 = vrot.lane.b32.xlu0 %v2170_v30, %s1840_s26  ;;  %v420_v50 = vsel %vm419_vm3, %v418_v54, %v397_v37  ;;  %s226_s26 = scalar_lea.vmem %s2353_s4, %s1683_s23 }
  0xa9   : > { %v839_v40 = vpop.permute.xlu0 %838  ;;  %v413_v59 = vpop.permute.xlu1 %412 }
  0xaa   : > { %531 = vrot.lane.b32.xlu1 %v512_v44, %s1843_s29  ;;  %515 = vrot.lane.b32.xlu0 %v510_v45, %s1838_s24  ;;  %v865_v58 = vsel %vm415_vm0, %v829_v20, %v839_v40  ;;  %v422_v20 = vsel %vm421_vm4, %v420_v50, %v401_v12 }
  0xab   : > { %v866_v18 = vsel %vm417_vm1, %v865_v58, %v843_v46 }
  0xad   : > { %v405_v53 = vpop.permute.xlu0 %404  ;;  %v859_v9 = vpop.permute.xlu1 %858 }
  0xae   : > { %539 = vrot.lane.b32.xlu1 %v513_v41, %s1842_s28  ;;  %1299 = vrot.lane.b32.xlu0 %v1279_v51, %s1843_s29  ;;  %v424_v47 = vsel %vm423_vm5, %v422_v20, %v405_v53  ;;  %v1441_v51 = vcombine.low %v2147_v22, %v2141_v17 }
  0xb0   : > { %v2239_v3 = vrot.slane %v1441_v51, %v1927_v34  ;;  %v1031_v34 = vcombine.high %v2162_v29, %v1837_v11  ;;  %v1692_v51 = vld [vmem:[%s2350_s1 + $0x8] sm:$0xf] }
  0xb1   : > { %v847_v35 = vpop.permute.xlu0 %846  ;;  %v1288_v13 = vpop.permute.xlu1 %1287 }
  0xb2   : > { %1033 = vrot.lane.b32.xlu1 %v1028_v42, %s1838_s24  ;;  %1303 = vrot.lane.b32.xlu0 %v1280_v60, %s1844_s30  ;;  %v867_v55 = vsel %vm419_vm3, %v866_v18, %v847_v35  ;;  %v1473_v48 = vcombine.high %v2239_v3, %v1837_v11 }
  0xb3   : > { %v868_v31 = vsel %vm421_vm4, %v867_v55, %v851_v39  ;;  %v1687_v39 = vld [vmem:[%s2350_s1 + $0x4] sm:$0xf] }
  0xb5   : > { %v409_v61 = vpop.permute.xlu0 %408  ;;  %v1296_v17 = vpop.permute.xlu1 %1295 }
  0xb6   : > { %1041 = vrot.lane.b32.xlu1 %v1029_v57, %s1841_s27  ;;  %1307 = vrot.lane.b32.xlu0 %v1281_v0, %s1842_s28  ;;  %v426_v60 = vsel %vm425_vm6, %v424_v47, %v409_v61  ;;  %v1474_v0 = vcombine.high %v2170_v30, %v1837_v11 }
  0xb7   : > { %v428_v63 = vsel %vm427_vm7, %v426_v60, %v413_v59 }
  0xb8   : > { %1717 = vmatpush3.msra.mxu1 %v428_v63 }
  0xb9   : > { %1726 = vmatprep.subr.mxu1 %v1837_v11  ;;  %1719 = vmatmul.mubr.msk.f32.vlgmr.msra.gmra.mrb[0].mxu1 %vm415_vm0, %v429_v62  ;;  %v855_v6 = vpop.permute.xlu0 %854 }
  0xba   : > { %1049 = vrot.lane.b32.xlu1 %v1030_v1, %s1843_s29  ;;  %1498 = vrot.lane.b32.xlu0 %v1472_v2, %s1844_s30  ;;  %v869_v38 = vsel %vm423_vm5, %v868_v31, %v855_v6  ;;  %v1689_v1 = vld [vmem:[%s2351_s2 + $0x4] sm:$0xf] }
  0xbb   : > { %1728 = vmatprep.mubr.msk.f32.mxu1 %vm1845_vm2, %v1837_v11  ;;  %v870_v14 = vsel %vm425_vm6, %v869_v38, %v859_v9  ;;  %v1694_v9 = vld [vmem:[%s2351_s2 + $0x8] sm:$0xf] }
  0xbd   : > { %v1284_v8 = vpop.permute.xlu0 %1283 }
  0xbe   : > { %1478 = vrot.lane.b32.xlu1 %v1473_v48, %s1838_s24  ;;  %1594 = vperm.xlu0 %1779, %v1591_v52   ;;  %v1310_v36 = vsel %vm415_vm0, %v1274_v21, %v1284_v8  ;;  %v549_v21 = vld [vmem:[%s2351_s2] sm:$0xf] }
  0xbf   : > { %v1311_v44 = vsel %vm417_vm1, %v1310_v36, %v1288_v13 }
  0xc1   : > { %v863_v10 = vpop.permute.xlu0 %862 }
  0xc2   : > { %1057 = vrot.lane.b32.xlu1 %v1031_v34, %s1842_s28  ;;  %v871_v50 = vsel %vm427_vm7, %v870_v14, %v863_v10 }
  0xc5   : > { %v1292_v16 = vpop.permute.xlu0 %1291 }
  0xc6   : > { %1486 = vrot.lane.b32.xlu1 %v1474_v0, %s1841_s27 }
  0xca   : > { %1494 = vrot.lane.b32.xlu1 %v1475_v7, %s1843_s29 }
  0xce   : > { %1502 = vrot.lane.b32.xlu1 %v1476_v5, %s1842_s28 }
 0x104   : > { %v520_v22 = vpop.permute.xlu1 %519 }
 0x105   : > { %v536_v19 = vpop.permute.xlu0 %535 }
 0x108   : > { %v528_v24 = vpop.permute.xlu1 %527 }
 0x10c   : > { %v1038_v23 = vpop.permute.xlu0 %1037 }
 0x110   : > { %v1046_v25 = vpop.permute.xlu0 %1045 }
 0x114   : > { %v2264_v26 = vpop.permute.xlu1 %1490  ;;  %v1054_v27 = vpop.permute.xlu0 %1053 }
 0x118   : > { %v524_v28 = vpop.permute.xlu1 %523  ;;  %v1483_v29 = vpop.permute.xlu0 %1482 }
 0x11c   : > { %v532_v32 = vpop.permute.xlu1 %531  ;;  %v516_v12 = vpop.permute.xlu0 %515 }
 0x11d   : > { %v542_v30 = vsel %vm415_vm0, %v2173_v33, %v516_v12  ;;  %v1312_v33 = vsel %vm419_vm3, %v1311_v44, %v1292_v16 }
 0x11e   : > { %v543_v37 = vsel %vm417_vm1, %v542_v30, %v520_v22  ;;  %v1313_v53 = vsel %vm421_vm4, %v1312_v33, %v1296_v17 }
 0x11f   : > { %v544_v43 = vsel %vm419_vm3, %v543_v37, %v524_v28 }
 0x120   : > { %v540_v45 = vpop.permute.xlu1 %539  ;;  %v1300_v46 = vpop.permute.xlu0 %1299  ;;  %v545_v40 = vsel %vm421_vm4, %v544_v43, %v528_v24 }
 0x121   : > { %v546_v54 = vsel %vm423_vm5, %v545_v40, %v532_v32  ;;  %v1314_v42 = vsel %vm423_vm5, %v1313_v53, %v1300_v46 }
 0x122   : > { %v547_v15 = vsel %vm425_vm6, %v546_v54, %v536_v19 }
 0x123   : > { %v548_v58 = vsel %vm427_vm7, %v547_v15, %v540_v45 }
 0x124   : > { %v1034_v18 = vpop.permute.xlu1 %1033  ;;  %1712 = vmatpush3.msk.msra.mxu0 %vm554_vm8, %v548_v58  ;;  %v1304_v41 = vpop.permute.xlu0 %1303 }
 0x125   : > { %1721 = vmatprep.subr.mxu0 %v1837_v11  ;;  %1714 = vmatmul.mubr.msk.f32.vlgmr.msra.gmra.mrb[0].mxu0 %vm550_vm9, %v549_v21  ;;  %v1315_v20 = vsel %vm425_vm6, %v1314_v42, %v1304_v41  ;;  %v1060_v47 = vsel %vm415_vm0, %v2200_v49, %v1034_v18 }
 0x126   : > { %1722 = vmatpush3.msra.mxu0 %v871_v50  ;;  %1723 = vmatprep.mubr.msk.f32.mxu0 %vm1845_vm2, %v1837_v11  ;;  %v1061_v56 = vsel %vm417_vm1, %v1060_v47, %v1038_v23 }
 0x127   : > { %1731 = vmatprep.subr.mxu0 %v1837_v11 }
 0x128   : > { %v1042_v35 = vpop.permute.xlu1 %1041  ;;  %v1308_v55 = vpop.permute.xlu0 %1307 }
 0x129   : > { %v1316_v31 = vsel %vm427_vm7, %v1315_v20, %v1308_v55  ;;  %1724 = vmatmul.mubr.msk.f32.vlgmr.msra.gmra.mrb[2].mxu0 %vm415_vm0, %v1687_v39  ;;  %v1062_v59 = vsel %vm419_vm3, %v1061_v56, %v1042_v35 }
 0x12a   : > { %1732 = vmatpush3.msra.mxu0 %v1316_v31  ;;  %1733 = vmatprep.mubr.msk.f32.mxu0 %vm1845_vm2, %v1837_v11  ;;  %v1063_v49 = vsel %vm421_vm4, %v1062_v59, %v1046_v25 }
 0x12c   : > { %v1050_v57 = vpop.permute.xlu1 %1049  ;;  %v1499_v5 = vpop.permute.xlu0 %1498 }
 0x12d   : > { %1734 = vmatmul.mubr.msk.f32.vlgmr.msra.gmra.mrb[4].mxu0 %vm415_vm0, %v1692_v51  ;;  %v1064_v60 = vsel %vm423_vm5, %v1063_v49, %v1050_v57 }
 0x12e   : > { %v1065_v63 = vsel %vm425_vm6, %v1064_v60, %v1054_v27 }
 0x130   : > { %v1479_v61 = vpop.permute.xlu1 %1478 }
 0x131   : > { %v1505_v2 = vsel %vm415_vm0, %v2239_v3, %v1479_v61 }
 0x132   : > { %v1506_v52 = vsel %vm417_vm1, %v1505_v2, %v1483_v29 }
 0x134   : > { %v1058_v62 = vpop.permute.xlu1 %1057 }
 0x135   : > { %v1066_v48 = vsel %vm427_vm7, %v1065_v63, %v1058_v62 }
 0x136   : > { %1727 = vmatpush3.msk.msra.mxu1 %vm554_vm8, %v1066_v48 }
 0x137   : > { %1729 = vmatmul.mubr.msk.f32.vlgmr.msra.gmra.mrb[2].mxu1 %vm550_vm9, %v1689_v1  ;;  %1736 = vmatprep.subr.mxu1 %v1837_v11 }
 0x138   : > { %v1487_v34 = vpop.permute.xlu1 %1486  ;;  %1738 = vmatprep.mubr.msk.f32.mxu1 %vm1845_vm2, %v1837_v11 }
 0x139   : > { %v1507_v0 = vsel %vm419_vm3, %v1506_v52, %v1487_v34 }
 0x13a   : > { %v1508_v3 = vsel %vm421_vm4, %v1507_v0, %v2264_v26 }
 0x13c   : > { %v1495_v4 = vpop.permute.xlu1 %1494 }
 0x13d   : > { %v1509_v7 = vsel %vm423_vm5, %v1508_v3, %v1495_v4  ;;  %v1595_v36 = vpop.permute.xlu0 %1594 }
 0x13e   : > { %v1510_v8 = vsel %vm425_vm6, %v1509_v7, %v1499_v5 }
 0x140   : > { %v1503_v6 = vpop.permute.xlu1 %1502 }
 0x141   : > { %v1511_v10 = vsel %vm427_vm7, %v1510_v8, %v1503_v6 }
 0x142   : > { %1737 = vmatpush3.msk.msra.mxu1 %vm554_vm8, %v1511_v10 }
 0x143   : > { %1739 = vmatmul.mubr.msk.f32.vlgmr.msra.gmra.mrb[4].mxu1 %vm550_vm9, %v1694_v9 }
 0x18c   : > { %v697_v11 = vpop.f32.mrb[0].mxu1 }
 0x18d   : > { %v1720_v13 = vpop.f32.mrb[1].mxu1 }
 0x1f8   : > { %v624_v16 = vpop.f32.mrb[0].mxu0 }
 0x1f9   : > { %v1715_v17 = vpop.f32.mrb[1].mxu0  ;;  %v698_v19 = vadd.f32 %v697_v11, %v624_v16 }
 0x1fc   : > { %v943_v22 = vpop.f32.mrb[2].mxu0 }
 0x1fd   : > { %v947_v23 = vadd.f32 %v943_v22, %v698_v19  ;;  %v1725_v24 = vpop.f32.mrb[3].mxu0 }
 0x200   : > { %v1388_v25 = vpop.f32.mrb[4].mxu0 }
 0x201   : > { %v1735_v26 = vpop.f32.mrb[5].mxu0 }
 0x20a   : > { %v1141_v27 = vpop.f32.mrb[2].mxu1 }
 0x20b   : > { %v1145_v28 = vadd.f32 %v1141_v27, %v947_v23  ;;  %v1730_v29 = vpop.f32.mrb[3].mxu1 }
 0x20d   : > { %v1392_v32 = vadd.f32 %v1388_v25, %v1145_v28 }
 0x216   : > { %v1586_v12 = vpop.f32.mrb[4].mxu1 }
 0x217   : > { %v1590_v30 = vadd.f32 %v1586_v12, %v1392_v32  ;;  %v1740_v37 = vpop.f32.mrb[5].mxu1 }
 0x219   : > { %v1597_v38 = vadd.f32 %v1595_v36, %v1590_v30 }
 0x21b   : > { %1599 = vst.msk [vmem:[%s226_s26] sm:$0xf] %vm1598_vm10, %v1597_v38 }
 0x21c PF: > { %s14_s17 = sadd.s32 1, %s1832_s17   ;;  %s2354_s15 = smov %s1828_s16 }
 0x21d   : > { %p11_p5 = scmp.ge.s32.totalorder %s14_s17, 4   ;;  %s2355_s16 = smov %s2357_s18 }
 0x21f   :  { %13 = sbr.rel (!%p11_p5) target bundleno = 2 (0x2), region = 70 }

</bundles_post_ra>
